<compile_context>
chip_gen: v5e
topology: v5e:2x2
jax: 0.10.0
libtpu: 0.0.40
codegen_flags: <defaults>
</compile_context>

<pallas_src>
import jax
import jax.numpy as jnp
from jax.experimental import pallas as pl
from jax.experimental.pallas import tpu as pltpu


def mlp_d_kernel(x_ref, w1_ref, aux_ref, o_ref):
    ndf = w1_ref.shape[1]

    x = x_ref[...]                                               # (B, D) f32

    # Layer 1: (B, D) @ (D, ndf) on the MXU, f32 throughout.
    h = jnp.dot(x, w1_ref[...], preferred_element_type=jnp.float32)
    h = jnp.maximum(h + aux_ref[2 * ndf:2 * ndf + 1, :], 0.0)    # + b1, ReLU

    # Layer 2: (B, ndf) @ (ndf, ndf)  (w2 = aux rows [0, ndf))
    h = jnp.dot(h, aux_ref[0:ndf, :], preferred_element_type=jnp.float32)
    h = jnp.maximum(h + aux_ref[2 * ndf + 1:2 * ndf + 2, :], 0.0)  # + b2, ReLU

    # Layer 3: (B, ndf) @ (ndf, ndf)  (w3 = aux rows [ndf, 2*ndf))
    h = jnp.dot(h, aux_ref[ndf:2 * ndf, :], preferred_element_type=jnp.float32)
    h = jnp.maximum(h + aux_ref[2 * ndf + 2:2 * ndf + 3, :], 0.0)  # + b3, ReLU

    # Layer 4 (output width 1) fused with the batch mean:
    #   mean_b(h @ w4 + b4) = sum_{b,j} h[b,j] * (w4[j]/B) + b4
    w4s = aux_ref[2 * ndf + 3:2 * ndf + 4, :]                    # (1, ndf), w4^T / B
    b4 = jnp.sum(aux_ref[2 * ndf + 4:2 * ndf + 5, :])            # zero-padded row -> b4
    o_ref[0, 0] = jnp.sum(h * w4s) + b4                          # scalar -> SMEM


def pack_params(params, batch):
    """Pack the 8 Linear params into 2 device arrays (done once, reused).

    Weights are stored transposed vs. PyTorch Linear, i.e. (in, out).
    NOTE: aux embeds w4/batch, so it is tied to the batch size used at call time.
    """
    w1, b1, w2, b2, w3, b3, w4, b4 = params
    ndf = w1.shape[1]
    aux = jnp.concatenate(
        [
            w2, w3,                                  # rows [0, 2*ndf): w2, w3
            b1, b2, b3,                              # rows 2*ndf .. 2*ndf+2: biases
            w4.reshape(1, ndf) / batch,              # row 2*ndf+3: w4^T pre-scaled by 1/B
            jnp.concatenate(                         # row 2*ndf+4: [b4, 0, ..., 0]
                [b4.reshape(1, 1), jnp.zeros((1, ndf - 1), jnp.float32)], axis=1),
        ],
        axis=0,
    ).astype(jnp.float32)                            # (2*ndf + 5, ndf) f32
    return w1.astype(jnp.float32), aux


def mlp_d_forward(x_nchw, packed):
    """x_nchw: (B, nc, isize, isize) float32. Returns shape (1,) like PyTorch."""
    B = x_nchw.shape[0]
    D = x_nchw.shape[1] * x_nchw.shape[2] * x_nchw.shape[3]
    w1, aux = packed

    x = x_nchw.reshape(B, D)                         # == torch .view, stays f32

    vmem = lambda: pl.BlockSpec(memory_space=pltpu.MemorySpace.VMEM)
    out = pl.pallas_call(
        mlp_d_kernel,
        out_shape=jax.ShapeDtypeStruct((1, 1), jnp.float32),
        in_specs=[vmem(), vmem(), vmem()],
        out_specs=pl.BlockSpec(memory_space=pltpu.MemorySpace.SMEM),
    )(x, w1, aux)
    return out.reshape(1)


def init_params(key, in_dim, ndf):
    """PyTorch-Linear-style init U(-1/sqrt(fan_in), 1/sqrt(fan_in)); weights (in, out)."""
    def linear(k, fan_in, fan_out):
        kw, kb = jax.random.split(k)
        bound = 1.0 / jnp.sqrt(fan_in)
        w = jax.random.uniform(kw, (fan_in, fan_out), jnp.float32, -bound, bound)
        b = jax.random.uniform(kb, (1, fan_out), jnp.float32, -bound, bound)
        return w, b

    k1, k2, k3, k4 = jax.random.split(key, 4)
    w1, b1 = linear(k1, in_dim, ndf)
    w2, b2 = linear(k2, ndf, ndf)
    w3, b3 = linear(k3, ndf, ndf)
    w4, b4 = linear(k4, ndf, 1)
    return (w1, b1, w2, b2, w3, b3, w4, b4)


def reference_forward(x_nchw, params):
    """Plain-JAX fp32 reference mirroring the PyTorch module."""
    B = x_nchw.shape[0]
    x = x_nchw.reshape(B, -1)
    w1, b1, w2, b2, w3, b3, w4, b4 = params
    hp = jax.lax.Precision.HIGHEST
    h = jnp.maximum(jnp.dot(x, w1, precision=hp) + b1, 0.0)
    h = jnp.maximum(jnp.dot(h, w2, precision=hp) + b2, 0.0)
    h = jnp.maximum(jnp.dot(h, w3, precision=hp) + b3, 0.0)
    out = jnp.dot(h, w4, precision=hp) + b4
    return out.mean(0).reshape(1)


if __name__ == "__main__":
    # MLP_D(isize=16, nz=8, nc=4, ndf=32, ngpu=1); nz unused by the discriminator.
    isize, nc, ndf = 16, 4, 32
    batch = 2
    in_dim = nc * isize * isize

    key = jax.random.PRNGKey(0)
    k_x, k_p = jax.random.split(key)
    x = jax.random.normal(k_x, (batch, nc, isize, isize), jnp.float32)
    params = init_params(k_p, in_dim, ndf)
    packed = pack_params(params, batch)

    out = mlp_d_forward(x, packed)
    out = jax.block_until_ready(out)

    ref = reference_forward(x, params)
    assert out.shape == (1,)
    assert jnp.allclose(out, ref, atol=2e-3, rtol=2e-3), (out, ref)
    print("KERNEL_OK")
</pallas_src>

<mosaic_0001>
module attributes {stable_mosaic.version = 11 : i64} {
  func.func @mlp_d_kernel(%arg0: memref<2x1024xf32, #tpu.memory_space<vmem>>, %arg1: memref<1024x32xf32, #tpu.memory_space<vmem>>, %arg2: memref<69x32xf32, #tpu.memory_space<vmem>>, %arg3: memref<1x1xf32, #tpu.memory_space<smem>>) attributes {dimension_semantics = [], scalar_prefetch = 0 : i64, scratch_operands = 0 : i64, tpu.core_type = #tpu.core_type<tc>} {
    %c0 = arith.constant 0 : index
    %c0_0 = arith.constant 0 : index
    %0 = vector.load %arg0[%c0, %c0_0] : memref<2x1024xf32, #tpu.memory_space<vmem>>, vector<2x1024xf32>
    %c0_1 = arith.constant 0 : index
    %c0_2 = arith.constant 0 : index
    %1 = vector.load %arg1[%c0_1, %c0_2] : memref<1024x32xf32, #tpu.memory_space<vmem>>, vector<1024x32xf32>
    %cst = arith.constant dense<0.000000e+00> : vector<2x32xf32>
    %2 = tpu.matmul %0, %1, %cst {dimension_numbers = #tpu.dot_dimension_numbers<[1], [0], [0], [1], [0, 0, 1, 1], [], []>} : vector<2x1024xf32>, vector<1024x32xf32>, vector<2x32xf32> -> vector<2x32xf32>
    %c64 = arith.constant 64 : index
    %c0_3 = arith.constant 0 : index
    %3 = vector.load %arg2[%c64, %c0_3] : memref<69x32xf32, #tpu.memory_space<vmem>>, vector<1x32xf32>
    %4 = vector.broadcast %3 : vector<1x32xf32> to vector<2x32xf32>
    %5 = arith.addf %2, %4 : vector<2x32xf32>
    %cst_4 = arith.constant 0.000000e+00 : f32
    %6 = vector.broadcast %cst_4 : f32 to vector<2x32xf32>
    %7 = arith.maximumf %5, %6 : vector<2x32xf32>
    %c0_5 = arith.constant 0 : index
    %c0_6 = arith.constant 0 : index
    %8 = vector.load %arg2[%c0_5, %c0_6] : memref<69x32xf32, #tpu.memory_space<vmem>>, vector<32x32xf32>
    %cst_7 = arith.constant dense<0.000000e+00> : vector<2x32xf32>
    %9 = tpu.matmul %7, %8, %cst_7 {dimension_numbers = #tpu.dot_dimension_numbers<[1], [0], [0], [1], [0, 0, 1, 1], [], []>} : vector<2x32xf32>, vector<32x32xf32>, vector<2x32xf32> -> vector<2x32xf32>
    %c65 = arith.constant 65 : index
    %c0_8 = arith.constant 0 : index
    %10 = vector.load %arg2[%c65, %c0_8] : memref<69x32xf32, #tpu.memory_space<vmem>>, vector<1x32xf32>
    %11 = vector.broadcast %10 : vector<1x32xf32> to vector<2x32xf32>
    %12 = arith.addf %9, %11 : vector<2x32xf32>
    %cst_9 = arith.constant 0.000000e+00 : f32
    %13 = vector.broadcast %cst_9 : f32 to vector<2x32xf32>
    %14 = arith.maximumf %12, %13 : vector<2x32xf32>
    %c32 = arith.constant 32 : index
    %c0_10 = arith.constant 0 : index
    %15 = vector.load %arg2[%c32, %c0_10] : memref<69x32xf32, #tpu.memory_space<vmem>>, vector<32x32xf32>
    %cst_11 = arith.constant dense<0.000000e+00> : vector<2x32xf32>
    %16 = tpu.matmul %14, %15, %cst_11 {dimension_numbers = #tpu.dot_dimension_numbers<[1], [0], [0], [1], [0, 0, 1, 1], [], []>} : vector<2x32xf32>, vector<32x32xf32>, vector<2x32xf32> -> vector<2x32xf32>
    %c66 = arith.constant 66 : index
    %c0_12 = arith.constant 0 : index
    %17 = vector.load %arg2[%c66, %c0_12] : memref<69x32xf32, #tpu.memory_space<vmem>>, vector<1x32xf32>
    %18 = vector.broadcast %17 : vector<1x32xf32> to vector<2x32xf32>
    %19 = arith.addf %16, %18 : vector<2x32xf32>
    %cst_13 = arith.constant 0.000000e+00 : f32
    %20 = vector.broadcast %cst_13 : f32 to vector<2x32xf32>
    %21 = arith.maximumf %19, %20 : vector<2x32xf32>
    %c67 = arith.constant 67 : index
    %c0_14 = arith.constant 0 : index
    %22 = vector.load %arg2[%c67, %c0_14] : memref<69x32xf32, #tpu.memory_space<vmem>>, vector<1x32xf32>
    %c68 = arith.constant 68 : index
    %c0_15 = arith.constant 0 : index
    %23 = vector.load %arg2[%c68, %c0_15] : memref<69x32xf32, #tpu.memory_space<vmem>>, vector<1x32xf32>
    %24 = vector.shape_cast %23 : vector<1x32xf32> to vector<1x1x32xf32>
    %cst_16 = arith.constant dense<0.000000e+00> : vector<1xf32>
    %25 = vector.multi_reduction <add>, %24, %cst_16 [1, 2] : vector<1x1x32xf32> to vector<1xf32>
    %26 = vector.shape_cast %25 : vector<1xf32> to vector<1x1x1xf32>
    %27 = vector.extract %26[0, 0, 0] : f32 from vector<1x1x1xf32>
    %28 = vector.broadcast %22 : vector<1x32xf32> to vector<2x32xf32>
    %29 = arith.mulf %21, %28 : vector<2x32xf32>
    %30 = vector.shape_cast %29 : vector<2x32xf32> to vector<1x2x32xf32>
    %cst_17 = arith.constant dense<0.000000e+00> : vector<1xf32>
    %31 = vector.multi_reduction <add>, %30, %cst_17 [1, 2] : vector<1x2x32xf32> to vector<1xf32>
    %32 = vector.shape_cast %31 : vector<1xf32> to vector<1x1x1xf32>
    %33 = vector.extract %32[0, 0, 0] : f32 from vector<1x1x1xf32>
    %34 = arith.addf %33, %27 : f32
    %c0_18 = arith.constant 0 : index
    %c0_19 = arith.constant 0 : index
    %35 = memref.load %arg3[%c0_18, %c0_19] : memref<1x1xf32, #tpu.memory_space<smem>>
    memref.store %34, %arg3[%c0_18, %c0_19] : memref<1x1xf32, #tpu.memory_space<smem>>
    return
  }
}

</mosaic_0001>

<bundles_post_ra>
// kernel: tpu_custom_call.1
= control target key start
LH: loop header
LB: loop body
LE: loop exit
PB: predicated region body
PF: predicated region fallthrough
CT: control target
= control target key end

     0   :  { %s912_s0 = inlined_call_operand.vmem [shape: f32[2,1024], index: 0, kind: input, shape index: {}]   ;;  %s913_s1 = inlined_call_operand.vmem [shape: f32[1024,32], index: 1, kind: input, shape index: {}]   ;;  %s914_s2 = inlined_call_operand.vmem [shape: f32[69,32], index: 2, kind: input, shape index: {}]   ;;  %s915_s3 = inlined_call_operand.hbm [shape: f32[1,1], index: 3, kind: output, shape index: {}]  }
   0x1   :  { %v64_v0 = vld [vmem:[%s913_s1 + $0x178] sm:$0xff]  ;;  %v63_v2 = vld [vmem:[%s913_s1 + $0x170] sm:$0xff]  ;;  %v62_v6 = vld [vmem:[%s913_s1 + $0x168] sm:$0xff] }
   0x2   :  { %v32_v1 = vld [vmem:[%s913_s1 + $0x78] sm:$0xff]  ;;  %208 = vmatpush.msra.mxu2 %v64_v0  ;;  %v31_v4 = vld [vmem:[%s913_s1 + $0x70] sm:$0xff]  ;;  %v30_v8 = vld [vmem:[%s913_s1 + $0x68] sm:$0xff] }
   0x3   :  { %168 = vmatpush.msra.mxu0 %v32_v1  ;;  %v80_v3 = vld [vmem:[%s913_s1 + $0x1f8] sm:$0xff]  ;;  %v79_v7 = vld [vmem:[%s913_s1 + $0x1f0] sm:$0xff]  ;;  %v78_v10 = vld [vmem:[%s913_s1 + $0x1e8] sm:$0xff] }
   0x4   :  { %v48_v5 = vld [vmem:[%s913_s1 + $0xf8] sm:$0xff]  ;;  %228 = vmatpush.msra.mxu3 %v80_v3  ;;  %209 = vmatpush.msra.mxu2 %v63_v2  ;;  %v47_v9 = vld [vmem:[%s913_s1 + $0xf0] sm:$0xff]  ;;  %v61_v11 = vld [vmem:[%s913_s1 + $0x160] sm:$0xff] }
   0x5   :  { %188 = vmatpush.msra.mxu1 %v48_v5  ;;  %169 = vmatpush.msra.mxu0 %v31_v4  ;;  %v29_v12 = vld [vmem:[%s913_s1 + $0x60] sm:$0xff]  ;;  %v46_v13 = vld [vmem:[%s913_s1 + $0xe8] sm:$0xff]  ;;  %v60_v16 = vld [vmem:[%s913_s1 + $0x158] sm:$0xff] }
   0x6   :  { %229 = vmatpush.msra.mxu3 %v79_v7  ;;  %210 = vmatpush.msra.mxu2 %v62_v6  ;;  %v77_v14 = vld [vmem:[%s913_s1 + $0x1e0] sm:$0xff]  ;;  %v28_v17 = vld [vmem:[%s913_s1 + $0x58] sm:$0xff]  ;;  %v59_v20 = vld [vmem:[%s913_s1 + $0x150] sm:$0xff] }
   0x7   :  { %189 = vmatpush.msra.mxu1 %v47_v9  ;;  %170 = vmatpush.msra.mxu0 %v30_v8  ;;  %v45_v15 = vld [vmem:[%s913_s1 + $0xe0] sm:$0xff]  ;;  %v76_v18 = vld [vmem:[%s913_s1 + $0x1d8] sm:$0xff]  ;;  %v27_v21 = vld [vmem:[%s913_s1 + $0x50] sm:$0xff] }
   0x8   :  { %230 = vmatpush.msra.mxu3 %v78_v10  ;;  %211 = vmatpush.msra.mxu2 %v61_v11  ;;  %v44_v19 = vld [vmem:[%s913_s1 + $0xd8] sm:$0xff]  ;;  %v75_v22 = vld [vmem:[%s913_s1 + $0x1d0] sm:$0xff]  ;;  %v58_v24 = vld [vmem:[%s913_s1 + $0x148] sm:$0xff] }
   0x9   :  { %190 = vmatpush.msra.mxu1 %v46_v13  ;;  %171 = vmatpush.msra.mxu0 %v29_v12  ;;  %v43_v23 = vld [vmem:[%s913_s1 + $0xd0] sm:$0xff]  ;;  %v26_v25 = vld [vmem:[%s913_s1 + $0x48] sm:$0xff]  ;;  %v57_v28 = vld [vmem:[%s913_s1 + $0x140] sm:$0xff] }
   0xa   :  { %231 = vmatpush.msra.mxu3 %v77_v14  ;;  %212 = vmatpush.msra.mxu2 %v60_v16  ;;  %v74_v26 = vld [vmem:[%s913_s1 + $0x1c8] sm:$0xff]  ;;  %v25_v29 = vld [vmem:[%s913_s1 + $0x40] sm:$0xff]  ;;  %v56_v32 = vld [vmem:[%s913_s1 + $0x138] sm:$0xff] }
   0xb   :  { %191 = vmatpush.msra.mxu1 %v45_v15  ;;  %172 = vmatpush.msra.mxu0 %v28_v17  ;;  %v42_v27 = vld [vmem:[%s913_s1 + $0xc8] sm:$0xff]  ;;  %v73_v30 = vld [vmem:[%s913_s1 + $0x1c0] sm:$0xff]  ;;  %v24_v33 = vld [vmem:[%s913_s1 + $0x38] sm:$0xff] }
   0xc   :  { %232 = vmatpush.msra.mxu3 %v76_v18  ;;  %213 = vmatpush.msra.mxu2 %v59_v20  ;;  %v41_v31 = vld [vmem:[%s913_s1 + $0xc0] sm:$0xff]  ;;  %v72_v34 = vld [vmem:[%s913_s1 + $0x1b8] sm:$0xff]  ;;  %v55_v36 = vld [vmem:[%s913_s1 + $0x130] sm:$0xff] }
   0xd   :  { %192 = vmatpush.msra.mxu1 %v44_v19  ;;  %173 = vmatpush.msra.mxu0 %v27_v21  ;;  %v40_v35 = vld [vmem:[%s913_s1 + $0xb8] sm:$0xff]  ;;  %v23_v37 = vld [vmem:[%s913_s1 + $0x30] sm:$0xff]  ;;  %v54_v40 = vld [vmem:[%s913_s1 + $0x128] sm:$0xff] }
   0xe   :  { %233 = vmatpush.msra.mxu3 %v75_v22  ;;  %214 = vmatpush.msra.mxu2 %v58_v24  ;;  %v71_v38 = vld [vmem:[%s913_s1 + $0x1b0] sm:$0xff]  ;;  %v22_v41 = vld [vmem:[%s913_s1 + $0x28] sm:$0xff]  ;;  %v53_v44 = vld [vmem:[%s913_s1 + $0x120] sm:$0xff] }
   0xf   :  { %193 = vmatpush.msra.mxu1 %v43_v23  ;;  %174 = vmatpush.msra.mxu0 %v26_v25  ;;  %v39_v39 = vld [vmem:[%s913_s1 + $0xb0] sm:$0xff]  ;;  %v70_v42 = vld [vmem:[%s913_s1 + $0x1a8] sm:$0xff]  ;;  %v21_v45 = vld [vmem:[%s913_s1 + $0x20] sm:$0xff] }
  0x10   :  { %234 = vmatpush.msra.mxu3 %v74_v26  ;;  %215 = vmatpush.msra.mxu2 %v57_v28  ;;  %v38_v43 = vld [vmem:[%s913_s1 + $0xa8] sm:$0xff]  ;;  %v69_v46 = vld [vmem:[%s913_s1 + $0x1a0] sm:$0xff]  ;;  %v52_v48 = vld [vmem:[%s913_s1 + $0x118] sm:$0xff] }
  0x11   :  { %194 = vmatpush.msra.mxu1 %v42_v27  ;;  %175 = vmatpush.msra.mxu0 %v25_v29  ;;  %v37_v47 = vld [vmem:[%s913_s1 + $0xa0] sm:$0xff]  ;;  %v20_v49 = vld [vmem:[%s913_s1 + $0x18] sm:$0xff]  ;;  %v51_v52 = vld [vmem:[%s913_s1 + $0x110] sm:$0xff] }
  0x12   :  { %235 = vmatpush.msra.mxu3 %v73_v30  ;;  %216 = vmatpush.msra.mxu2 %v56_v32  ;;  %v68_v50 = vld [vmem:[%s913_s1 + $0x198] sm:$0xff]  ;;  %v19_v53 = vld [vmem:[%s913_s1 + $0x10] sm:$0xff]  ;;  %v50_v56 = vld [vmem:[%s913_s1 + $0x108] sm:$0xff] }
  0x13   :  { %195 = vmatpush.msra.mxu1 %v41_v31  ;;  %176 = vmatpush.msra.mxu0 %v24_v33  ;;  %v36_v51 = vld [vmem:[%s913_s1 + $0x98] sm:$0xff]  ;;  %v67_v54 = vld [vmem:[%s913_s1 + $0x190] sm:$0xff]  ;;  %v18_v57 = vld [vmem:[%s913_s1 + $0x8] sm:$0xff] }
  0x14   :  { %236 = vmatpush.msra.mxu3 %v72_v34  ;;  %217 = vmatpush.msra.mxu2 %v55_v36  ;;  %v35_v55 = vld [vmem:[%s913_s1 + $0x90] sm:$0xff]  ;;  %v66_v58 = vld [vmem:[%s913_s1 + $0x188] sm:$0xff]  ;;  %v49_v60 = vld [vmem:[%s913_s1 + $0x100] sm:$0xff] }
  0x15   :  { %196 = vmatpush.msra.mxu1 %v40_v35  ;;  %177 = vmatpush.msra.mxu0 %v23_v37  ;;  %v34_v59 = vld [vmem:[%s913_s1 + $0x88] sm:$0xff]  ;;  %v17_v61 = vld [vmem:[%s913_s1] sm:$0xff]  ;;  %v128_v62 = vld [vmem:[%s913_s1 + $0x378] sm:$0xff] }
  0x16   :  { %237 = vmatpush.msra.mxu3 %v71_v38  ;;  %218 = vmatpush.msra.mxu2 %v54_v40  ;;  %v65_v63 = vld [vmem:[%s913_s1 + $0x180] sm:$0xff]  ;;  %v96_v0 = vld [vmem:[%s913_s1 + $0x278] sm:$0xff]  ;;  %v127_v2 = vld [vmem:[%s913_s1 + $0x370] sm:$0xff] }
  0x17   :  { %197 = vmatpush.msra.mxu1 %v39_v39  ;;  %178 = vmatpush.msra.mxu0 %v22_v41  ;;  %v144_v1 = vld [vmem:[%s913_s1 + $0x3f8] sm:$0xff]  ;;  %v33_v3 = vld [vmem:[%s913_s1 + $0x80] sm:$0xff]  ;;  %v95_v4 = vld [vmem:[%s913_s1 + $0x270] sm:$0xff] }
  0x18   :  { %238 = vmatpush.msra.mxu3 %v70_v42  ;;  %219 = vmatpush.msra.mxu2 %v53_v44  ;;  %v112_v5 = vld [vmem:[%s913_s1 + $0x2f8] sm:$0xff]  ;;  %v126_v6 = vld [vmem:[%s913_s1 + $0x368] sm:$0xff]  ;;  %v143_v7 = vld [vmem:[%s913_s1 + $0x3f0] sm:$0xff] }
  0x19   :  { %198 = vmatpush.msra.mxu1 %v38_v43  ;;  %179 = vmatpush.msra.mxu0 %v21_v45  ;;  %v94_v8 = vld [vmem:[%s913_s1 + $0x268] sm:$0xff]  ;;  %v111_v9 = vld [vmem:[%s913_s1 + $0x2f0] sm:$0xff]  ;;  %v125_v10 = vld [vmem:[%s913_s1 + $0x360] sm:$0xff] }
  0x1a   :  { %239 = vmatpush.msra.mxu3 %v69_v46  ;;  %220 = vmatpush.msra.mxu2 %v52_v48  ;;  %v142_v11 = vld [vmem:[%s913_s1 + $0x3e8] sm:$0xff]  ;;  %v93_v12 = vld [vmem:[%s913_s1 + $0x260] sm:$0xff]  ;;  %v124_v15 = vld [vmem:[%s913_s1 + $0x358] sm:$0xff] }
  0x1b   :  { %199 = vmatpush.msra.mxu1 %v37_v47  ;;  %180 = vmatpush.msra.mxu0 %v20_v49  ;;  %v110_v13 = vld [vmem:[%s913_s1 + $0x2e8] sm:$0xff]  ;;  %v15_v14 = vld [vmem:[%s912_s0] sm:$0xff]  ;;  %v92_v17 = vld [vmem:[%s913_s1 + $0x258] sm:$0xff] }
  0x1c   :  { %240 = vmatpush.msra.mxu3 %v68_v50  ;;  %221 = vmatpush.msra.mxu2 %v51_v52  ;;  %v141_v16 = vld [vmem:[%s913_s1 + $0x3e0] sm:$0xff]  ;;  %149 = vst [vmem:[#allocation1] ss:$4 sm:$0xff] %v15_v14  ;;  %v123_v19 = vld [vmem:[%s913_s1 + $0x350] sm:$0xff]  ;;  %v140_v20 = vld [vmem:[%s913_s1 + $0x3d8] sm:$0xff] }
  0x1d   :  { %200 = vmatpush.msra.mxu1 %v36_v51  ;;  %181 = vmatpush.msra.mxu0 %v19_v53  ;;  %v109_v18 = vld [vmem:[%s913_s1 + $0x2e0] sm:$0xff]  ;;  %v91_v21 = vld [vmem:[%s913_s1 + $0x250] sm:$0xff]  ;;  %v108_v22 = vld [vmem:[%s913_s1 + $0x2d8] sm:$0xff] }
  0x1e   :  { %241 = vmatpush.msra.mxu3 %v67_v54  ;;  %222 = vmatpush.msra.mxu2 %v50_v56  ;;  %v122_v23 = vld [vmem:[%s913_s1 + $0x348] sm:$0xff]  ;;  %v139_v24 = vld [vmem:[%s913_s1 + $0x3d0] sm:$0xff]  ;;  %v121_v28 = vld [vmem:[%s913_s1 + $0x340] sm:$0xff] }
  0x1f   :  { %201 = vmatpush.msra.mxu1 %v35_v55  ;;  %182 = vmatpush.msra.mxu0 %v18_v57  ;;  %v16_v25 = vld [vmem:[%s912_s0 + $0x8] sm:$0xff]  ;;  %v107_v27 = vld [vmem:[%s913_s1 + $0x2d0] sm:$0xff]  ;;  %v89_v30 = vld [vmem:[%s913_s1 + $0x240] sm:$0xff] }
  0x20   :  { %242 = vmatpush.msra.mxu3 %v66_v58  ;;  %223 = vmatpush.msra.mxu2 %v49_v60  ;;  %v90_v26 = vld [vmem:[%s913_s1 + $0x248] sm:$0xff]  ;;  %151 = vst [vmem:[#allocation1 + $0x20] ss:$4 sm:$0xff] %v16_v25  ;;  %v120_v32 = vld [vmem:[%s913_s1 + $0x338] sm:$0xff]  ;;  %v137_v33 = vld [vmem:[%s913_s1 + $0x3c0] sm:$0xff] }
  0x21   :  { %202 = vmatpush.msra.mxu1 %v34_v59  ;;  %183 = vmatpush.msra.mxu0 %v17_v61  ;;  %v138_v29 = vld [vmem:[%s913_s1 + $0x3c8] sm:$0xff]  ;;  %v88_v34 = vld [vmem:[%s913_s1 + $0x238] sm:$0xff]  ;;  %v105_v35 = vld [vmem:[%s913_s1 + $0x2c0] sm:$0xff] }
  0x22   :  { %288 = vmatpush.msrb.mxu2 %v128_v62  ;;  %243 = vmatpush.msra.mxu3 %v65_v63  ;;  %v106_v31 = vld [vmem:[%s913_s1 + $0x2c8] sm:$0xff]  ;;  %v119_v36 = vld [vmem:[%s913_s1 + $0x330] sm:$0xff]  ;;  %v136_v37 = vld [vmem:[%s913_s1 + $0x3b8] sm:$0xff] }
  0x23   :  { %248 = vmatpush.msrb.mxu0 %v96_v0  ;;  %203 = vmatpush.msra.mxu1 %v33_v3 }
  0x24   :  { %308 = vmatpush.msrb.mxu3 %v144_v1  ;;  %289 = vmatpush.msrb.mxu2 %v127_v2 }
  0x25   :  { %249 = vmatpush.msrb.mxu0 %v95_v4  ;;  %268 = vmatpush.msrb.mxu1 %v112_v5 }
  0x26   :  { %290 = vmatpush.msrb.mxu2 %v126_v6  ;;  %309 = vmatpush.msrb.mxu3 %v143_v7 }
  0x27   :  { %250 = vmatpush.msrb.mxu0 %v94_v8  ;;  %269 = vmatpush.msrb.mxu1 %v111_v9 }
  0x28   :  { %291 = vmatpush.msrb.mxu2 %v125_v10  ;;  %310 = vmatpush.msrb.mxu3 %v142_v11 }
  0x29   :  { %251 = vmatpush.msrb.mxu0 %v93_v12  ;;  %270 = vmatpush.msrb.mxu1 %v110_v13 }
  0x2a   :  { %292 = vmatpush.msrb.mxu2 %v124_v15  ;;  %311 = vmatpush.msrb.mxu3 %v141_v16 }
  0x2b   :  { %252 = vmatpush.msrb.mxu0 %v92_v17  ;;  %271 = vmatpush.msrb.mxu1 %v109_v18 }
  0x2c   :  { %293 = vmatpush.msrb.mxu2 %v123_v19  ;;  %312 = vmatpush.msrb.mxu3 %v140_v20 }
  0x2d   :  { %253 = vmatpush.msrb.mxu0 %v91_v21  ;;  %272 = vmatpush.msrb.mxu1 %v108_v22 }
  0x2e   :  { %294 = vmatpush.msrb.mxu2 %v122_v23  ;;  %313 = vmatpush.msrb.mxu3 %v139_v24 }
  0x2f   :  { %254 = vmatpush.msrb.mxu0 %v90_v26  ;;  %273 = vmatpush.msrb.mxu1 %v107_v27 }
  0x30   :  { %295 = vmatpush.msrb.mxu2 %v121_v28  ;;  %314 = vmatpush.msrb.mxu3 %v138_v29 }
  0x31   :  { %255 = vmatpush.msrb.mxu0 %v89_v30  ;;  %274 = vmatpush.msrb.mxu1 %v106_v31 }
  0x32   :  { %8 = vsyncpa [#allocation3], 0  ;;  %296 = vmatpush.msrb.mxu2 %v120_v32  ;;  %315 = vmatpush.msrb.mxu3 %v137_v33  ;;  %v87_v38 = vld [vmem:[%s913_s1 + $0x230] sm:$0xff]  ;;  %v104_v39 = vld [vmem:[%s913_s1 + $0x2b8] sm:$0xff]  ;;  %vm335_vm0 = vcmask 261120   ;;  %vm392_vm1 = vcmask 253952  }
  0x33   :  { %256 = vmatpush.msrb.mxu0 %v88_v34  ;;  %275 = vmatpush.msrb.mxu1 %v105_v35  ;;  %v118_v40 = vld [vmem:[%s913_s1 + $0x328] sm:$0xff]  ;;  %v135_v41 = vld [vmem:[%s913_s1 + $0x3b0] sm:$0xff]  ;;  %v117_v44 = vld [vmem:[%s913_s1 + $0x320] sm:$0xff]  ;;  %vm405_vm2 = vcmask 254976   ;;  %s424_s25 = sshll.u32 %s915_s3, 4  ;;  %s459_s28 = smov [#allocation2]   ;;  %s425_s25 = int_to_ptr.hbm [resolvable:$true] %s424_s25 }
  0x34   :  { %297 = vmatpush.msrb.mxu2 %v119_v36  ;;  %316 = vmatpush.msrb.mxu3 %v136_v37  ;;  %v86_v42 = vld [vmem:[%s913_s1 + $0x228] sm:$0xff]  ;;  %v103_v43 = vld [vmem:[%s913_s1 + $0x2b0] sm:$0xff]  ;;  %v85_v47 = vld [vmem:[%s913_s1 + $0x220] sm:$0xff] }
  0x35   :  { %257 = vmatpush.msrb.mxu0 %v87_v38  ;;  %276 = vmatpush.msrb.mxu1 %v104_v39  ;;  %v134_v45 = vld [vmem:[%s913_s1 + $0x3a8] sm:$0xff]  ;;  %v154_v46 = vld.sshfl [vmem:[#allocation1 + $0x10] sm:$0xff pattern:$0x73625140]  ;;  %v116_v49 = vld [vmem:[%s913_s1 + $0x318] sm:$0xff] }
  0x36   :  { %298 = vmatpush.msrb.mxu2 %v118_v40  ;;  %317 = vmatpush.msrb.mxu3 %v135_v41  ;;  %v102_v48 = vld [vmem:[%s913_s1 + $0x2a8] sm:$0xff]  ;;  %v133_v50 = vld [vmem:[%s913_s1 + $0x3a0] sm:$0xff]  ;;  %v155_v52 = vld.sshfl [vmem:[#allocation1 + $0x18] sm:$0xff pattern:$0x73625140] }
  0x37   :  { %258 = vmatpush.msrb.mxu0 %v86_v42  ;;  %277 = vmatpush.msrb.mxu1 %v103_v43  ;;  %v152_v51 = vld.sshfl [vmem:[#allocation1] sm:$0xff pattern:$0x73625140]  ;;  %v84_v53 = vld [vmem:[%s913_s1 + $0x218] sm:$0xff]  ;;  %v115_v55 = vld [vmem:[%s913_s1 + $0x310] sm:$0xff] }
  0x38   :  { %299 = vmatpush.msrb.mxu2 %v117_v44  ;;  %318 = vmatpush.msrb.mxu3 %v134_v45  ;;  %v101_v54 = vld [vmem:[%s913_s1 + $0x2a0] sm:$0xff]  ;;  %v132_v56 = vld [vmem:[%s913_s1 + $0x398] sm:$0xff]  ;;  %v153_v57 = vld.sshfl [vmem:[#allocation1 + $0x8] sm:$0xff pattern:$0x73625140] }
  0x39   :  { %224 = vmatmul.f32.vlgmr.msra.gmra.mxu2 %v154_v46  ;;  %259 = vmatpush.msrb.mxu0 %v85_v47  ;;  %v83_v58 = vld [vmem:[%s913_s1 + $0x210] sm:$0xff]  ;;  %v100_v59 = vld [vmem:[%s913_s1 + $0x298] sm:$0xff]  ;;  %v114_v60 = vld [vmem:[%s913_s1 + $0x308] sm:$0xff] }
  0x3a   :  { %278 = vmatpush.msrb.mxu1 %v102_v48  ;;  %300 = vmatpush.msrb.mxu2 %v116_v49  ;;  %v131_v61 = vld [vmem:[%s913_s1 + $0x390] sm:$0xff]  ;;  %v82_v62 = vld [vmem:[%s913_s1 + $0x208] sm:$0xff]  ;;  %v113_v0 = vld [vmem:[%s913_s1 + $0x300] sm:$0xff] }
  0x3b   :  { %319 = vmatpush.msrb.mxu3 %v133_v50  ;;  %184 = vmatmul.f32.vlgmr.msra.gmra.mxu0 %v152_v51  ;;  %v99_v63 = vld [vmem:[%s913_s1 + $0x290] sm:$0xff]  ;;  %v130_v1 = vld [vmem:[%s913_s1 + $0x388] sm:$0xff]  ;;  %v81_v3 = vld [vmem:[%s913_s1 + $0x200] sm:$0xff] }
  0x3c   :  { %244 = vmatmul.f32.vlgmr.msra.gmra.mxu3 %v155_v52  ;;  %260 = vmatpush.msrb.mxu0 %v84_v53  ;;  %v158_v2 = vld.sshfl [vmem:[#allocation1 + $0x30] sm:$0xff pattern:$0x73625140]  ;;  %v98_v4 = vld [vmem:[%s913_s1 + $0x288] sm:$0xff]  ;;  %v129_v5 = vld [vmem:[%s913_s1 + $0x380] sm:$0xff] }
  0x3d   :  { %279 = vmatpush.msrb.mxu1 %v101_v54  ;;  %301 = vmatpush.msrb.mxu2 %v115_v55  ;;  %v156_v6 = vld.sshfl [vmem:[#allocation1 + $0x20] sm:$0xff pattern:$0x73625140]  ;;  %v159_v7 = vld.sshfl [vmem:[#allocation1 + $0x38] sm:$0xff pattern:$0x73625140] }
  0x3e   :  { %320 = vmatpush.msrb.mxu3 %v132_v56  ;;  %204 = vmatmul.f32.vlgmr.msra.gmra.mxu1 %v153_v57  ;;  %v97_v8 = vld [vmem:[%s913_s1 + $0x280] sm:$0xff]  ;;  %v157_v9 = vld.sshfl [vmem:[#allocation1 + $0x28] sm:$0xff pattern:$0x73625140]  ;;  %v332_v10 = vld [vmem:[%s914_s2 + $0x18] sm:$0xff] }
  0x3f   :  { %261 = vmatpush.msrb.mxu0 %v83_v58  ;;  %280 = vmatpush.msrb.mxu1 %v100_v59  ;;  %v331_v11 = vld [vmem:[%s914_s2 + $0x10] sm:$0xff]  ;;  %v330_v12 = vld [vmem:[%s914_s2 + $0x8] sm:$0xff]  ;;  %v329_v13 = vld [vmem:[%s914_s2] sm:$0xff] }
  0x40   :  { %302 = vmatpush.msrb.mxu2 %v114_v60  ;;  %321 = vmatpush.msrb.mxu3 %v131_v61  ;;  %v363_v14 = vld [vmem:[%s914_s2 + $0x38] sm:$0xff]  ;;  %v362_v15 = vld [vmem:[%s914_s2 + $0x30] sm:$0xff]  ;;  %v441_v16 = vld [vmem:[%s914_s2 + $0x40] ss:$0 sm:$0xff] }
  0x41   :  { %262 = vmatpush.msrb.mxu0 %v82_v62  ;;  %281 = vmatpush.msrb.mxu1 %v99_v63  ;;  %v361_v34 = vld [vmem:[%s914_s2 + $0x28] sm:$0xff]  ;;  %v360_v35 = vld [vmem:[%s914_s2 + $0x20] sm:$0xff] }
  0x42   :  { %303 = vmatpush.msrb.mxu2 %v113_v0  ;;  %322 = vmatpush.msrb.mxu3 %v130_v1  ;;  %v391_v36 = vld [vmem:[%s914_s2 + $0x44] sm:$0x1]  ;;  %v442_v38 = vld [vmem:[%s914_s2 + $0x41] ss:$0 sm:$0xff]  ;;  %v443_v49 = vld [vmem:[%s914_s2 + $0x42] ss:$0 sm:$0xff] }
  0x43   :  { %304 = vmatmul.f32.vlgmr.msrb.gmra.mxu2 %v158_v2  ;;  %263 = vmatpush.msrb.mxu0 %v81_v3  ;;  %v393_v37 = vsel %vm392_vm1, %v391_v36, 0.0  ;;  %v444_v52 = vld [vmem:[%s914_s2 + $0x43] ss:$0 sm:$0xff] }
  0x44   :  { %282 = vmatpush.msrb.mxu1 %v98_v4  ;;  %323 = vmatpush.msrb.mxu3 %v129_v5 }
  0x45   :  { %264 = vmatmul.f32.vlgmr.msrb.gmra.mxu0 %v156_v6  ;;  %324 = vmatmul.f32.vlgmr.msrb.gmra.mxu3 %v159_v7 }
  0x46   :  { %283 = vmatpush.msrb.mxu1 %v97_v8  ;;  %351 = vmatpush.msra.mxu0 %v332_v10 }
  0x47   :  { %284 = vmatmul.f32.vlgmr.msrb.gmra.mxu1 %v157_v9  ;;  %394 = vadd.xlane.f32.xlu0 %v393_v37 }
  0x48   :  { %352 = vmatpush.msra.mxu0 %v331_v11  ;;  %381 = vmatpush.msra.mxu1 %v363_v14 }
  0x4a   :  { %353 = vmatpush.msra.mxu0 %v330_v12  ;;  %382 = vmatpush.msra.mxu1 %v362_v15 }
  0x4c   :  { %354 = vmatpush.msra.mxu0 %v329_v13  ;;  %383 = vmatpush.msra.mxu1 %v361_v34 }
  0x4e   :  { %384 = vmatpush.msra.mxu1 %v360_v35 }
  0xb8   :  { %v185_v17 = vpop.f32.mrf.mxu0 }
  0xb9   :  { %v186_v18 = vadd.f32 %v441_v16, %v185_v17 }
  0xba   :  { %v395_v42 = vpop.xlane.xlu0 %394 }
  0xbb   :  { %v205_v19 = vpop.f32.mrf.mxu1  ;;  %v396_v43 = vrot.slane %v395_v42, 4 }
  0xbc   :  { %v206_v20 = vadd.f32 %v205_v19, %v186_v18  ;;  %v225_v21 = vpop.f32.mrf.mxu2 }
  0xbd   :  { %v397_v44 = vadd.f32 %v396_v43, %v395_v42 }
  0xbe   :  { %v226_v22 = vadd.f32 %v225_v21, %v206_v20 }
  0xbf   :  { %v245_v23 = vpop.f32.mrf.mxu3  ;;  %v398_v45 = vrot.slane %v397_v44, 2 }
  0xc0   :  { %v246_v24 = vadd.f32 %v245_v23, %v226_v22 }
  0xc1   :  { %v399_v46 = vadd.f32 %v398_v45, %v397_v44 }
  0xc2   :  { %v265_v25 = vpop.f32.mrf.mxu0 }
  0xc3   :  { %v266_v26 = vadd.f32 %v265_v25, %v246_v24  ;;  %v400_v47 = vrot.slane %v399_v46, 1 }
  0xc4   :  { %v285_v27 = vpop.f32.mrf.mxu1 }
  0xc5   :  { %v286_v28 = vadd.f32 %v285_v27, %v266_v26  ;;  %v401_v48 = vadd.f32 %v400_v47, %v399_v46 }
  0xc6   :  { %v305_v29 = vpop.f32.mrf.mxu2 }
  0xc7   :  { %v306_v30 = vadd.f32 %v305_v29, %v286_v28  ;;  %436 = vpush %v401_v48 }
  0xc8   :  { %v325_v31 = vpop.f32.mrf.mxu3 }
  0xc9   :  { %v326_v32 = vadd.f32 %v325_v31, %v306_v30 }
  0xcb   :  { %v328_v33 = vmax.f32 %v326_v32, 0.0 }
  0xcd   :  { %434 = vmatmul.msk.f32.vlgmr.msra.gmra.mxu0 %vm335_vm0, %v328_v33 }
  0xf8   :  { %s437_s26 = spop %436 }
 0x14a   :  { %v356_v39 = vpop.f32.mrf.mxu0 }
 0x14b   :  { %v357_v40 = vadd.f32 %v442_v38, %v356_v39 }
 0x14d   :  { %v359_v41 = vmax.f32 %v357_v40, 0.0 }
 0x14f   :  { %435 = vmatmul.msk.f32.vlgmr.msra.gmra.mxu1 %vm335_vm0, %v359_v41 }
 0x1cc   :  { %v386_v50 = vpop.f32.mrf.mxu1 }
 0x1cd   :  { %v387_v51 = vadd.f32 %v443_v49, %v386_v50 }
 0x1cf   :  { %v389_v53 = vmax.f32 %v387_v51, 0.0 }
 0x1d1   :  { %v404_v54 = vmul.f32 %v444_v52, %v389_v53 }
 0x1d3   :  { %v406_v55 = vsel %vm405_vm2, %v404_v54, 0.0 }
 0x1d4   :  { %407 = vadd.xlane.f32.xlu0 %v406_v55 }
 0x247   :  { %v408_v56 = vpop.xlane.xlu0 %407 }
 0x248   :  { %v409_v57 = vrot.slane %v408_v56, 4 }
 0x24a   :  { %v410_v58 = vadd.f32 %v409_v57, %v408_v56 }
 0x24c   :  { %v411_v59 = vrot.slane %v410_v58, 2 }
 0x24e   :  { %v412_v60 = vadd.f32 %v411_v59, %v410_v58 }
 0x250   :  { %v413_v61 = vrot.slane %v412_v60, 1 }
 0x252   :  { %v414_v62 = vadd.f32 %v413_v61, %v412_v60 }
 0x254   :  { %438 = vpush %v414_v62 }
 0x285   :  { %s439_s27 = spop %438 }
 0x286   :  { %s416_s2 = sadd.f32 %s439_s27, %s437_s26 }
 0x288   :  { %418 = sst [smem:[#allocation2]] %s416_s2 }
 0x289   :  { %427 = dma.smem_to_hbm %s459_s28, 16, %s425_s25, [#allocation3]  }
 0x28a   :  { %457 = dma.done.wait [#allocation3], 16  }
 0x28b   :  { %458 = vsyncadd [#allocation3], 4294967280 }
 0x28c   :  { %432 = sfence }
 0x28d   :  { %433 = vsyncpa [#allocation3], 1 }

</bundles_post_ra>
